<compile_context>
chip_gen: v7x
topology: tpu7x:2x2x1
jax: 0.10.0
libtpu: 0.0.40
codegen_flags: <defaults>
</compile_context>

<pallas_src>
import functools

import jax
import jax.numpy as jnp
from jax.experimental import pallas as pl
from jax.experimental.pallas import tpu as pltpu

INPUT_DIM = 60
HIDDEN_DIMS = [256, 256, 256, 256]
NUM_CLASSES = 2

PADDED_IN = 64      # 60 -> 64 (sublane-aligned K for the first matmul)
PADDED_OUT = 128    # 2 -> 128 (lane-dense output slab; avoids masked partial stores)
MAX_TB = 1024       # batch tile (rows); fits comfortably in scoped VMEM on v5e/v6e/v7x


def _round_up(n, m):
    return ((n + m - 1) // m) * m


def deepnet_kernel(x_ref,
                   w1_ref, b1_ref,
                   w2_ref, b2_ref,
                   w3_ref, b3_ref,
                   w4_ref, b4_ref,
                   w5_ref, b5_ref,
                   o_ref):
    # bf16 operands for the MXU, f32 accumulation + f32 VPU elementwise (bias/ReLU).
    h = x_ref[...].astype(jnp.bfloat16)

    h = jnp.dot(h, w1_ref[...], preferred_element_type=jnp.float32) + b1_ref[...]
    h = jnp.maximum(h, 0.0)

    h = jnp.dot(h.astype(jnp.bfloat16), w2_ref[...],
                preferred_element_type=jnp.float32) + b2_ref[...]
    h = jnp.maximum(h, 0.0)

    h = jnp.dot(h.astype(jnp.bfloat16), w3_ref[...],
                preferred_element_type=jnp.float32) + b3_ref[...]
    h = jnp.maximum(h, 0.0)

    h = jnp.dot(h.astype(jnp.bfloat16), w4_ref[...],
                preferred_element_type=jnp.float32) + b4_ref[...]
    h = jnp.maximum(h, 0.0)

    logits = jnp.dot(h.astype(jnp.bfloat16), w5_ref[...],
                     preferred_element_type=jnp.float32) + b5_ref[...]
    o_ref[...] = logits.astype(o_ref.dtype)


def pack_params(params):
    """Pad / transpose / cast params for the kernel.

    Input: list of (W, b) with W (in_dim, out_dim) f32, b (out_dim,) f32.
    Output: flat list [W1, b1, ..., W5, b5] with
      W1 padded to (PADDED_IN, 256), W5 padded to (256, PADDED_OUT),
      weights cast to bf16 (MXU operands), biases kept f32 shaped (1, out_padded).
    """
    packed = []
    n = len(params)
    for i, (w, b) in enumerate(params):
        if i == 0:
            w = jnp.pad(w, ((0, PADDED_IN - w.shape[0]), (0, 0)))
        if i == n - 1:
            w = jnp.pad(w, ((0, 0), (0, PADDED_OUT - w.shape[1])))
            b = jnp.pad(b, ((0, PADDED_OUT - b.shape[0]),))
        packed.append(w.astype(jnp.bfloat16))
        packed.append(b.astype(jnp.float32).reshape(1, -1))
    return packed


@jax.jit
def deepnet_forward(x, packed_params):
    """x: (B, INPUT_DIM) float32. packed_params: output of pack_params."""
    B = x.shape[0]

    # Pad features 60 -> 64 and batch up to a multiple of the batch tile.
    x_pad = jnp.pad(x, ((0, 0), (0, PADDED_IN - INPUT_DIM)))
    TB = min(MAX_TB, _round_up(B, 8))
    B_pad = _round_up(B, TB)
    if B_pad != B:
        x_pad = jnp.pad(x_pad, ((0, B_pad - B), (0, 0)))

    grid = (B_pad // TB,)

    x_spec = pl.BlockSpec((TB, PADDED_IN), lambda i: (i, 0))
    out_spec = pl.BlockSpec((TB, PADDED_OUT), lambda i: (i, 0))
    # Weights/biases: constant index_map -> DMA'd once, resident across grid steps.
    param_specs = [pl.BlockSpec(p.shape, lambda i: (0, 0)) for p in packed_params]

    out_padded = pl.pallas_call(
        deepnet_kernel,
        out_shape=jax.ShapeDtypeStruct((B_pad, PADDED_OUT), jnp.float32),
        grid=grid,
        in_specs=[x_spec] + param_specs,
        out_specs=out_spec,
        compiler_params=pltpu.CompilerParams(
            dimension_semantics=("parallel",),
            vmem_limit_bytes=64 << 20,
        ),
    )(x_pad, *packed_params)

    return out_padded[:B, :NUM_CLASSES]


def init_params(key):
    """Deterministic init mimicking torch.nn.Linear (uniform +/- 1/sqrt(fan_in)).

    Stored as W (in_dim, out_dim) = torch weight transposed; b (out_dim,).
    """
    dims = [INPUT_DIM] + HIDDEN_DIMS + [NUM_CLASSES]
    params = []
    for i in range(len(dims) - 1):
        in_dim, out_dim = dims[i], dims[i + 1]
        key, kw, kb = jax.random.split(key, 3)
        bound = 1.0 / (in_dim ** 0.5)
        w = jax.random.uniform(kw, (in_dim, out_dim), jnp.float32, -bound, bound)
        b = jax.random.uniform(kb, (out_dim,), jnp.float32, -bound, bound)
        params.append((w, b))
    return params


def reference_forward(x, params):
    """Pure-JAX f32 reference (dropout is identity in eval mode)."""
    h = x
    for i, (w, b) in enumerate(params):
        h = h @ w + b
        if i < len(params) - 1:
            h = jnp.maximum(h, 0.0)
    return h


if __name__ == "__main__":
    key = jax.random.PRNGKey(0)
    key, kx = jax.random.split(key)

    B = 8  # small batch
    x = jax.random.normal(kx, (B, INPUT_DIM), jnp.float32)
    params = init_params(key)
    packed = pack_params(params)

    out = deepnet_forward(x, packed)
    out = jax.block_until_ready(out)

    ref = reference_forward(x, params)
    assert out.shape == (B, NUM_CLASSES), out.shape
    # bf16 matmul operands (f32 accumulation) -> loosened tolerance vs f32 reference.
    assert jnp.allclose(out, ref, atol=2e-2, rtol=2e-2), (
        f"max abs err = {jnp.max(jnp.abs(out - ref))}")

    print("KERNEL_OK")
</pallas_src>

<mosaic_0001>
module attributes {stable_mosaic.version = 11 : i64} {
  func.func @deepnet_kernel(%arg0: i32, %arg1: memref<8x64xf32, #tpu.memory_space<vmem>>, %arg2: memref<64x256xbf16, #tpu.memory_space<vmem>>, %arg3: memref<1x256xf32, #tpu.memory_space<vmem>>, %arg4: memref<256x256xbf16, #tpu.memory_space<vmem>>, %arg5: memref<1x256xf32, #tpu.memory_space<vmem>>, %arg6: memref<256x256xbf16, #tpu.memory_space<vmem>>, %arg7: memref<1x256xf32, #tpu.memory_space<vmem>>, %arg8: memref<256x256xbf16, #tpu.memory_space<vmem>>, %arg9: memref<1x256xf32, #tpu.memory_space<vmem>>, %arg10: memref<256x128xbf16, #tpu.memory_space<vmem>>, %arg11: memref<1x128xf32, #tpu.memory_space<vmem>>, %arg12: memref<8x128xf32, #tpu.memory_space<vmem>>) attributes {dimension_semantics = [#tpu.dimension_semantics<parallel>], iteration_bounds = array<i64: 1>, scalar_prefetch = 0 : i64, scratch_operands = 0 : i64, tpu.core_type = #tpu.core_type<tc>, window_params = [{transform_indices = @transform_0, window_bounds = array<i64: 8, 64>}, {pipeline_mode = #tpu.pipeline_mode<synchronous>, transform_indices = @transform_1, window_bounds = array<i64: 64, 256>}, {pipeline_mode = #tpu.pipeline_mode<synchronous>, transform_indices = @transform_2, window_bounds = array<i64: 1, 256>}, {pipeline_mode = #tpu.pipeline_mode<synchronous>, transform_indices = @transform_3, window_bounds = array<i64: 256, 256>}, {pipeline_mode = #tpu.pipeline_mode<synchronous>, transform_indices = @transform_4, window_bounds = array<i64: 1, 256>}, {pipeline_mode = #tpu.pipeline_mode<synchronous>, transform_indices = @transform_5, window_bounds = array<i64: 256, 256>}, {pipeline_mode = #tpu.pipeline_mode<synchronous>, transform_indices = @transform_6, window_bounds = array<i64: 1, 256>}, {pipeline_mode = #tpu.pipeline_mode<synchronous>, transform_indices = @transform_7, window_bounds = array<i64: 256, 256>}, {pipeline_mode = #tpu.pipeline_mode<synchronous>, transform_indices = @transform_8, window_bounds = array<i64: 1, 256>}, {pipeline_mode = #tpu.pipeline_mode<synchronous>, transform_indices = @transform_9, window_bounds = array<i64: 256, 128>}, {pipeline_mode = #tpu.pipeline_mode<synchronous>, transform_indices = @transform_10, window_bounds = array<i64: 1, 128>}, {transform_indices = @transform_11, window_bounds = array<i64: 8, 128>}]} {
    %c0 = arith.constant 0 : index
    %c0_0 = arith.constant 0 : index
    %0 = vector.load %arg1[%c0, %c0_0] : memref<8x64xf32, #tpu.memory_space<vmem>>, vector<8x64xf32>
    %1 = arith.truncf %0 : vector<8x64xf32> to vector<8x64xbf16>
    %c0_1 = arith.constant 0 : index
    %c0_2 = arith.constant 0 : index
    %2 = vector.load %arg2[%c0_1, %c0_2] : memref<64x256xbf16, #tpu.memory_space<vmem>>, vector<64x256xbf16>
    %cst = arith.constant dense<0.000000e+00> : vector<8x256xf32>
    %3 = tpu.matmul %1, %2, %cst {dimension_numbers = #tpu.dot_dimension_numbers<[1], [0], [0], [1], [0, 0, 1, 1], [], []>} : vector<8x64xbf16>, vector<64x256xbf16>, vector<8x256xf32> -> vector<8x256xf32>
    %c0_3 = arith.constant 0 : index
    %c0_4 = arith.constant 0 : index
    %4 = vector.load %arg3[%c0_3, %c0_4] : memref<1x256xf32, #tpu.memory_space<vmem>>, vector<1x256xf32>
    %5 = vector.broadcast %4 : vector<1x256xf32> to vector<8x256xf32>
    %6 = arith.addf %3, %5 : vector<8x256xf32>
    %cst_5 = arith.constant 0.000000e+00 : f32
    %7 = vector.broadcast %cst_5 : f32 to vector<8x256xf32>
    %8 = arith.maximumf %6, %7 : vector<8x256xf32>
    %9 = arith.truncf %8 : vector<8x256xf32> to vector<8x256xbf16>
    %c0_6 = arith.constant 0 : index
    %c0_7 = arith.constant 0 : index
    %10 = vector.load %arg4[%c0_6, %c0_7] : memref<256x256xbf16, #tpu.memory_space<vmem>>, vector<256x256xbf16>
    %cst_8 = arith.constant dense<0.000000e+00> : vector<8x256xf32>
    %11 = tpu.matmul %9, %10, %cst_8 {dimension_numbers = #tpu.dot_dimension_numbers<[1], [0], [0], [1], [0, 0, 1, 1], [], []>} : vector<8x256xbf16>, vector<256x256xbf16>, vector<8x256xf32> -> vector<8x256xf32>
    %c0_9 = arith.constant 0 : index
    %c0_10 = arith.constant 0 : index
    %12 = vector.load %arg5[%c0_9, %c0_10] : memref<1x256xf32, #tpu.memory_space<vmem>>, vector<1x256xf32>
    %13 = vector.broadcast %12 : vector<1x256xf32> to vector<8x256xf32>
    %14 = arith.addf %11, %13 : vector<8x256xf32>
    %cst_11 = arith.constant 0.000000e+00 : f32
    %15 = vector.broadcast %cst_11 : f32 to vector<8x256xf32>
    %16 = arith.maximumf %14, %15 : vector<8x256xf32>
    %17 = arith.truncf %16 : vector<8x256xf32> to vector<8x256xbf16>
    %c0_12 = arith.constant 0 : index
    %c0_13 = arith.constant 0 : index
    %18 = vector.load %arg6[%c0_12, %c0_13] : memref<256x256xbf16, #tpu.memory_space<vmem>>, vector<256x256xbf16>
    %cst_14 = arith.constant dense<0.000000e+00> : vector<8x256xf32>
    %19 = tpu.matmul %17, %18, %cst_14 {dimension_numbers = #tpu.dot_dimension_numbers<[1], [0], [0], [1], [0, 0, 1, 1], [], []>} : vector<8x256xbf16>, vector<256x256xbf16>, vector<8x256xf32> -> vector<8x256xf32>
    %c0_15 = arith.constant 0 : index
    %c0_16 = arith.constant 0 : index
    %20 = vector.load %arg7[%c0_15, %c0_16] : memref<1x256xf32, #tpu.memory_space<vmem>>, vector<1x256xf32>
    %21 = vector.broadcast %20 : vector<1x256xf32> to vector<8x256xf32>
    %22 = arith.addf %19, %21 : vector<8x256xf32>
    %cst_17 = arith.constant 0.000000e+00 : f32
    %23 = vector.broadcast %cst_17 : f32 to vector<8x256xf32>
    %24 = arith.maximumf %22, %23 : vector<8x256xf32>
    %25 = arith.truncf %24 : vector<8x256xf32> to vector<8x256xbf16>
    %c0_18 = arith.constant 0 : index
    %c0_19 = arith.constant 0 : index
    %26 = vector.load %arg8[%c0_18, %c0_19] : memref<256x256xbf16, #tpu.memory_space<vmem>>, vector<256x256xbf16>
    %cst_20 = arith.constant dense<0.000000e+00> : vector<8x256xf32>
    %27 = tpu.matmul %25, %26, %cst_20 {dimension_numbers = #tpu.dot_dimension_numbers<[1], [0], [0], [1], [0, 0, 1, 1], [], []>} : vector<8x256xbf16>, vector<256x256xbf16>, vector<8x256xf32> -> vector<8x256xf32>
    %c0_21 = arith.constant 0 : index
    %c0_22 = arith.constant 0 : index
    %28 = vector.load %arg9[%c0_21, %c0_22] : memref<1x256xf32, #tpu.memory_space<vmem>>, vector<1x256xf32>
    %29 = vector.broadcast %28 : vector<1x256xf32> to vector<8x256xf32>
    %30 = arith.addf %27, %29 : vector<8x256xf32>
    %cst_23 = arith.constant 0.000000e+00 : f32
    %31 = vector.broadcast %cst_23 : f32 to vector<8x256xf32>
    %32 = arith.maximumf %30, %31 : vector<8x256xf32>
    %33 = arith.truncf %32 : vector<8x256xf32> to vector<8x256xbf16>
    %c0_24 = arith.constant 0 : index
    %c0_25 = arith.constant 0 : index
    %34 = vector.load %arg10[%c0_24, %c0_25] : memref<256x128xbf16, #tpu.memory_space<vmem>>, vector<256x128xbf16>
    %cst_26 = arith.constant dense<0.000000e+00> : vector<8x128xf32>
    %35 = tpu.matmul %33, %34, %cst_26 {dimension_numbers = #tpu.dot_dimension_numbers<[1], [0], [0], [1], [0, 0, 1, 1], [], []>} : vector<8x256xbf16>, vector<256x128xbf16>, vector<8x128xf32> -> vector<8x128xf32>
    %c0_27 = arith.constant 0 : index
    %c0_28 = arith.constant 0 : index
    %36 = vector.load %arg11[%c0_27, %c0_28] : memref<1x128xf32, #tpu.memory_space<vmem>>, vector<1x128xf32>
    %37 = vector.broadcast %36 : vector<1x128xf32> to vector<8x128xf32>
    %38 = arith.addf %35, %37 : vector<8x128xf32>
    %c0_29 = arith.constant 0 : index
    %c0_30 = arith.constant 0 : index
    %39 = vector.load %arg12[%c0_29, %c0_30] : memref<8x128xf32, #tpu.memory_space<vmem>>, vector<8x128xf32>
    tpu.vector_store %arg12[%c0_29, %c0_30], %38 {strides = array<i32>} : memref<8x128xf32, #tpu.memory_space<vmem>>, vector<8x128xf32>,
    return
  }
  func.func @transform_0(%arg0: i32) -> (i32, i32) {
    %c0_i32 = arith.constant 0 : i32
    %c0_i32_0 = arith.constant 0 : i32
    return %arg0, %c0_i32 : i32, i32
  }
  func.func @transform_1(%arg0: i32) -> (i32, i32) {
    %c0_i32 = arith.constant 0 : i32
    %c0_i32_0 = arith.constant 0 : i32
    %c0_i32_1 = arith.constant 0 : i32
    return %c0_i32, %c0_i32_0 : i32, i32
  }
  func.func @transform_2(%arg0: i32) -> (i32, i32) {
    %c0_i32 = arith.constant 0 : i32
    %c0_i32_0 = arith.constant 0 : i32
    %c0_i32_1 = arith.constant 0 : i32
    return %c0_i32, %c0_i32_0 : i32, i32
  }
  func.func @transform_3(%arg0: i32) -> (i32, i32) {
    %c0_i32 = arith.constant 0 : i32
    %c0_i32_0 = arith.constant 0 : i32
    %c0_i32_1 = arith.constant 0 : i32
    return %c0_i32, %c0_i32_0 : i32, i32
  }
  func.func @transform_4(%arg0: i32) -> (i32, i32) {
    %c0_i32 = arith.constant 0 : i32
    %c0_i32_0 = arith.constant 0 : i32
    %c0_i32_1 = arith.constant 0 : i32
    return %c0_i32, %c0_i32_0 : i32, i32
  }
  func.func @transform_5(%arg0: i32) -> (i32, i32) {
    %c0_i32 = arith.constant 0 : i32
    %c0_i32_0 = arith.constant 0 : i32
    %c0_i32_1 = arith.constant 0 : i32
    return %c0_i32, %c0_i32_0 : i32, i32
  }
  func.func @transform_6(%arg0: i32) -> (i32, i32) {
    %c0_i32 = arith.constant 0 : i32
    %c0_i32_0 = arith.constant 0 : i32
    %c0_i32_1 = arith.constant 0 : i32
    return %c0_i32, %c0_i32_0 : i32, i32
  }
  func.func @transform_7(%arg0: i32) -> (i32, i32) {
    %c0_i32 = arith.constant 0 : i32
    %c0_i32_0 = arith.constant 0 : i32
    %c0_i32_1 = arith.constant 0 : i32
    return %c0_i32, %c0_i32_0 : i32, i32
  }
  func.func @transform_8(%arg0: i32) -> (i32, i32) {
    %c0_i32 = arith.constant 0 : i32
    %c0_i32_0 = arith.constant 0 : i32
    %c0_i32_1 = arith.constant 0 : i32
    return %c0_i32, %c0_i32_0 : i32, i32
  }
  func.func @transform_9(%arg0: i32) -> (i32, i32) {
    %c0_i32 = arith.constant 0 : i32
    %c0_i32_0 = arith.constant 0 : i32
    %c0_i32_1 = arith.constant 0 : i32
    return %c0_i32, %c0_i32_0 : i32, i32
  }
  func.func @transform_10(%arg0: i32) -> (i32, i32) {
    %c0_i32 = arith.constant 0 : i32
    %c0_i32_0 = arith.constant 0 : i32
    %c0_i32_1 = arith.constant 0 : i32
    return %c0_i32, %c0_i32_0 : i32, i32
  }
  func.func @transform_11(%arg0: i32) -> (i32, i32) {
    %c0_i32 = arith.constant 0 : i32
    %c0_i32_0 = arith.constant 0 : i32
    return %arg0, %c0_i32 : i32, i32
  }
}

</mosaic_0001>

<bundles_post_ra>
// kernel: deepnet_forward.1
= control target key start
LH: loop header
LB: loop body
LE: loop exit
PB: predicated region body
PF: predicated region fallthrough
CT: control target
= control target key end

     0   :  { %16 = vsyncpa [#allocation3], 0  ;;  %s2087_s0 = inlined_call_operand.hbm [shape: f32[8,64], index: 0, kind: input, shape index: {}]   ;;  %s2088_s1 = inlined_call_operand.hbm [shape: bf16[64,256], index: 1, kind: input, shape index: {}]   ;;  %s2089_s2 = inlined_call_operand.hbm [shape: f32[1,256], index: 2, kind: input, shape index: {}]   ;;  %s2090_s3 = inlined_call_operand.hbm [shape: bf16[256,256], index: 3, kind: input, shape index: {}]   ;;  %s2091_s4 = inlined_call_operand.hbm [shape: f32[1,256], index: 4, kind: input, shape index: {}]   ;;  %s2092_s5 = inlined_call_operand.hbm [shape: bf16[256,256], index: 5, kind: input, shape index: {}]   ;;  %s2093_s6 = inlined_call_operand.hbm [shape: f32[1,256], index: 6, kind: input, shape index: {}]   ;;  %s2094_s7 = inlined_call_operand.hbm [shape: bf16[256,256], index: 7, kind: input, shape index: {}]   ;;  %s2095_s8 = inlined_call_operand.hbm [shape: f32[1,256], index: 8, kind: input, shape index: {}]   ;;  %s2096_s9 = inlined_call_operand.hbm [shape: bf16[256,128], index: 9, kind: input, shape index: {}]   ;;  %s2097_s10 = inlined_call_operand.hbm [shape: f32[1,128], index: 10, kind: input, shape index: {}]   ;;  %s2098_s11 = inlined_call_operand.hbm [shape: f32[8,128], index: 11, kind: output, shape index: {}]  }
   0x1   :  { %17 = vsyncpa [#allocation6], 0 }
   0x2   :  { %18 = vsyncpa [#allocation9], 0 }
   0x3   :  { %19 = vsyncpa [#allocation12], 0 }
   0x4   :  { %20 = vsyncpa [#allocation15], 0 }
   0x5   :  { %21 = vsyncpa [#allocation18], 0 }
   0x6   :  { %22 = vsyncpa [#allocation4], 0  ;;  %s1842_s17 = smov [#allocation5]   ;;  %s1564_s21 = scalar_lea.hbm %s2088_s1, 1024 }
   0x7   :  { %s38_s18 = sshll.u32 %s1842_s17, 4  ;;  %p1565_p0 = scmp.ne.s32.totalorder %s2088_s1, %s1564_s21  ;;  %s39_s18 = int_to_ptr.vmem [resolvable:$true] %s38_s18 }
   0x8   :  { %p1568_p1 = scmp.lt.u32.totalorder %s1564_s21, %s2088_s1 }
   0xa   :  { %p1570_p2 = pnand %p1568_p1, %p1565_p0 }
   0xc   :  { %1573 = shalt.err (!%p1570_p2)
}
   0xd   :  { %s1574_s26 = scalar_lea.vmem %s39_s18, 1024  ;;  %p1579_p4 = scmp.lt.s32.totalorder %s39_s18, %s39_s18 }
   0xe   :  { %p1575_p3 = scmp.ne.s32.totalorder %s39_s18, %s1574_s26  ;;  %p1580_p5 = scmp.lt.s32.totalorder %s1574_s26, %s1574_s26 }
  0x10   :  { %p1581_p6 = por %p1580_p5, %p1579_p4 }
  0x12   :  { %p1582_p7 = pnand %p1581_p6, %p1575_p3 }
  0x14   :  { %1585 = shalt.err (!%p1582_p7)
}
  0x15   :  { %s1843_s27 = smov 128   ;;  %s1844_s28 = smov 8  }
  0x16   :  { %44 = dma.hbm_to_vmem [thread:$0]  %s2088_s1, 1024, %s39_s18, [#allocation6], %s1843_s27, %s1843_s27, %s1844_s28  }
  0x17   :  { %s1845_s12 = smov [#allocation8]   ;;  %s1846_s14 = smov [#allocation11]  }
  0x18   :  { %s60_s13 = sshll.u32 %s1845_s12, 4  ;;  %s82_s15 = sshll.u32 %s1846_s14, 4  ;;  %s61_s13 = int_to_ptr.vmem [resolvable:$true] %s60_s13  ;;  %s83_s15 = int_to_ptr.vmem [resolvable:$true] %s82_s15 }
  0x19   :  { %s1586_s19 = scalar_lea.hbm %s2090_s3, 4096 }
  0x1a   :  { %p1587_p8 = scmp.ne.s32.totalorder %s2090_s3, %s1586_s19  ;;  %p1590_p9 = scmp.lt.u32.totalorder %s1586_s19, %s2090_s3 }
  0x1c   :  { %p1592_p10 = pnand %p1590_p9, %p1587_p8 }
  0x1e   :  { %1595 = shalt.err (!%p1592_p10)
}
  0x1f   :  { %s1596_s1 = scalar_lea.vmem %s61_s13, 4096  ;;  %p1601_p12 = scmp.lt.s32.totalorder %s61_s13, %s61_s13 }
  0x20   :  { %p1597_p11 = scmp.ne.s32.totalorder %s61_s13, %s1596_s1  ;;  %p1602_p13 = scmp.lt.s32.totalorder %s1596_s1, %s1596_s1 }
  0x22   :  { %p1603_p0 = por %p1602_p13, %p1601_p12 }
  0x24   :  { %p1604_p1 = pnand %p1603_p0, %p1597_p11 }
  0x26   :  { %1607 = shalt.err (!%p1604_p1)
}
  0x27   :  { %66 = dma.hbm_to_vmem [thread:$0]  %s2090_s3, 4096, %s61_s13, [#allocation9], %s1843_s27, %s1843_s27, %s1844_s28  }
  0x28   :  { %s1608_s29 = scalar_lea.hbm %s2092_s5, 4096 }
  0x29   :  { %p1609_p2 = scmp.ne.s32.totalorder %s2092_s5, %s1608_s29  ;;  %p1612_p3 = scmp.lt.u32.totalorder %s1608_s29, %s2092_s5 }
  0x2b   :  { %p1614_p4 = pnand %p1612_p3, %p1609_p2 }
  0x2d   :  { %1617 = shalt.err (!%p1614_p4)
}
  0x2e   :  { %s1618_s17 = scalar_lea.vmem %s83_s15, 4096  ;;  %p1623_p6 = scmp.lt.s32.totalorder %s83_s15, %s83_s15 }
  0x2f   :  { %p1619_p5 = scmp.ne.s32.totalorder %s83_s15, %s1618_s17  ;;  %p1624_p7 = scmp.lt.s32.totalorder %s1618_s17, %s1618_s17 }
  0x31   :  { %p1625_p8 = por %p1624_p7, %p1623_p6 }
  0x33   :  { %p1626_p9 = pnand %p1625_p8, %p1619_p5 }
  0x35   :  { %1629 = shalt.err (!%p1626_p9)
}
  0x36   :  { %88 = dma.hbm_to_vmem [thread:$0]  %s2092_s5, 4096, %s83_s15, [#allocation12], %s1843_s27, %s1843_s27, %s1844_s28  }
  0x37   :  { %s1847_s19 = smov [#allocation14]   ;;  %s1848_s21 = smov [#allocation17]  }
  0x38   :  { %s104_s20 = sshll.u32 %s1847_s19, 4  ;;  %s126_s22 = sshll.u32 %s1848_s21, 4  ;;  %s105_s20 = int_to_ptr.vmem [resolvable:$true] %s104_s20  ;;  %s127_s22 = int_to_ptr.vmem [resolvable:$true] %s126_s22 }
  0x39   :  { %s1630_s18 = scalar_lea.hbm %s2094_s7, 4096 }
  0x3a   :  { %p1631_p10 = scmp.ne.s32.totalorder %s2094_s7, %s1630_s18  ;;  %p1634_p11 = scmp.lt.u32.totalorder %s1630_s18, %s2094_s7 }
  0x3c   :  { %p1636_p12 = pnand %p1634_p11, %p1631_p10 }
  0x3e   :  { %1639 = shalt.err (!%p1636_p12)
}
  0x3f   :  { %s1640_s5 = scalar_lea.vmem %s105_s20, 4096  ;;  %p1645_p0 = scmp.lt.s32.totalorder %s105_s20, %s105_s20 }
  0x40   :  { %p1641_p13 = scmp.ne.s32.totalorder %s105_s20, %s1640_s5  ;;  %p1646_p1 = scmp.lt.s32.totalorder %s1640_s5, %s1640_s5 }
  0x42   :  { %p1647_p2 = por %p1646_p1, %p1645_p0 }
  0x44   :  { %p1648_p3 = pnand %p1647_p2, %p1641_p13 }
  0x46   :  { %1651 = shalt.err (!%p1648_p3)
}
  0x47   :  { %110 = dma.hbm_to_vmem [thread:$0]  %s2094_s7, 4096, %s105_s20, [#allocation15], %s1843_s27, %s1843_s27, %s1844_s28  }
  0x48   :  { %s1652_s16 = scalar_lea.hbm %s2096_s9, 2048 }
  0x49   :  { %p1653_p4 = scmp.ne.s32.totalorder %s2096_s9, %s1652_s16  ;;  %p1656_p5 = scmp.lt.u32.totalorder %s1652_s16, %s2096_s9 }
  0x4b   :  { %p1658_p6 = pnand %p1656_p5, %p1653_p4 }
  0x4d   :  { %1661 = shalt.err (!%p1658_p6)
}
  0x4e   :  { %s1662_s21 = scalar_lea.vmem %s127_s22, 2048  ;;  %p1667_p8 = scmp.lt.s32.totalorder %s127_s22, %s127_s22 }
  0x4f   :  { %p1663_p7 = scmp.ne.s32.totalorder %s127_s22, %s1662_s21  ;;  %p1668_p9 = scmp.lt.s32.totalorder %s1662_s21, %s1662_s21 }
  0x51   :  { %p1669_p10 = por %p1668_p9, %p1667_p8 }
  0x53   :  { %p1670_p11 = pnand %p1669_p10, %p1663_p7 }
  0x55   :  { %1673 = shalt.err (!%p1670_p11)
}
  0x56   :  { %s1849_s7 = smov 64   ;;  %s1850_s27 = smov 4  }
  0x57   :  { %132 = dma.hbm_to_vmem [thread:$0]  %s2096_s9, 2048, %s127_s22, [#allocation18], %s1849_s7, %s1849_s7, %s1850_s27  }
  0x58   :  { %s1851_s23 = smov [#allocation2]   ;;  %s1852_s18 = smov [#allocation7]  }
  0x59   :  { %s29_s1 = sshll.u32 %s1851_s23, 4  ;;  %s51_s24 = sshll.u32 %s1852_s18, 4  ;;  %s30_s1 = int_to_ptr.vmem [resolvable:$true] %s29_s1  ;;  %s52_s24 = int_to_ptr.vmem [resolvable:$true] %s51_s24 }
  0x5a   :  { %s1674_s29 = scalar_lea.hbm %s2087_s0, 128 }
  0x5b   :  { %p1675_p12 = scmp.ne.s32.totalorder %s2087_s0, %s1674_s29  ;;  %p1678_p13 = scmp.lt.u32.totalorder %s1674_s29, %s2087_s0 }
  0x5d   :  { %p1680_p0 = pnand %p1678_p13, %p1675_p12 }
  0x5f   :  { %1683 = shalt.err (!%p1680_p0)
}
  0x60   :  { %s1684_s9 = scalar_lea.vmem %s30_s1, 128  ;;  %p1689_p2 = scmp.lt.s32.totalorder %s30_s1, %s30_s1 }
  0x61   :  { %p1685_p1 = scmp.ne.s32.totalorder %s30_s1, %s1684_s9  ;;  %p1690_p3 = scmp.lt.s32.totalorder %s1684_s9, %s1684_s9 }
  0x63   :  { %p1691_p4 = por %p1690_p3, %p1689_p2 }
  0x65   :  { %p1692_p5 = pnand %p1691_p4, %p1685_p1 }
  0x67   :  { %1695 = shalt.err (!%p1692_p5)
}
  0x68   :  { %32 = dma.hbm_to_vmem [thread:$0]  %s2087_s0, 128, %s30_s1, [#allocation3]  }
  0x69   :  { %s1696_s3 = scalar_lea.hbm %s2089_s2, 32 }
  0x6a   :  { %p1697_p6 = scmp.ne.s32.totalorder %s2089_s2, %s1696_s3  ;;  %p1700_p7 = scmp.lt.u32.totalorder %s1696_s3, %s2089_s2 }
  0x6c   :  { %p1702_p8 = pnand %p1700_p7, %p1697_p6 }
  0x6e   :  { %1705 = shalt.err (!%p1702_p8)
}
  0x6f   :  { %s1706_s27 = scalar_lea.vmem %s52_s24, 32  ;;  %p1711_p10 = scmp.lt.s32.totalorder %s52_s24, %s52_s24 }
  0x70   :  { %p1707_p9 = scmp.ne.s32.totalorder %s52_s24, %s1706_s27  ;;  %p1712_p11 = scmp.lt.s32.totalorder %s1706_s27, %s1706_s27 }
  0x72   :  { %p1713_p12 = por %p1712_p11, %p1711_p10 }
  0x74   :  { %p1714_p13 = pnand %p1713_p12, %p1707_p9 }
  0x76   :  { %1717 = shalt.err (!%p1714_p13)
}
  0x77   :  { %54 = dma.hbm_to_vmem [thread:$0]  %s2089_s2, 32, %s52_s24, [#allocation6]  }
  0x78   :  { %s1853_s20 = smov [#allocation10]   ;;  %s1854_s1 = smov [#allocation13]  }
  0x79   :  { %s73_s23 = sshll.u32 %s1853_s20, 4  ;;  %s95_s18 = sshll.u32 %s1854_s1, 4  ;;  %s74_s23 = int_to_ptr.vmem [resolvable:$true] %s73_s23  ;;  %s96_s18 = int_to_ptr.vmem [resolvable:$true] %s95_s18 }
  0x7a   :  { %s1718_s29 = scalar_lea.hbm %s2091_s4, 32 }
  0x7b   :  { %p1719_p0 = scmp.ne.s32.totalorder %s2091_s4, %s1718_s29  ;;  %p1722_p1 = scmp.lt.u32.totalorder %s1718_s29, %s2091_s4 }
  0x7d   :  { %p1724_p2 = pnand %p1722_p1, %p1719_p0 }
  0x7f   :  { %1727 = shalt.err (!%p1724_p2)
}
  0x80   :  { %s1728_s2 = scalar_lea.vmem %s74_s23, 32  ;;  %p1733_p4 = scmp.lt.s32.totalorder %s74_s23, %s74_s23 }
  0x81   :  { %p1729_p3 = scmp.ne.s32.totalorder %s74_s23, %s1728_s2  ;;  %p1734_p5 = scmp.lt.s32.totalorder %s1728_s2, %s1728_s2 }
  0x83   :  { %p1735_p6 = por %p1734_p5, %p1733_p4 }
  0x85   :  { %p1736_p7 = pnand %p1735_p6, %p1729_p3 }
  0x87   :  { %1739 = shalt.err (!%p1736_p7)
}
  0x88   :  { %76 = dma.hbm_to_vmem [thread:$0]  %s2091_s4, 32, %s74_s23, [#allocation9]  }
  0x89   :  { %s1740_s16 = scalar_lea.hbm %s2093_s6, 32 }
  0x8a   :  { %p1741_p8 = scmp.ne.s32.totalorder %s2093_s6, %s1740_s16  ;;  %p1744_p9 = scmp.lt.u32.totalorder %s1740_s16, %s2093_s6 }
  0x8c   :  { %p1746_p10 = pnand %p1744_p9, %p1741_p8 }
  0x8e   :  { %1749 = shalt.err (!%p1746_p10)
}
  0x8f   :  { %s1750_s21 = scalar_lea.vmem %s96_s18, 32  ;;  %p1755_p12 = scmp.lt.s32.totalorder %s96_s18, %s96_s18 }
  0x90   :  { %p1751_p11 = scmp.ne.s32.totalorder %s96_s18, %s1750_s21  ;;  %p1756_p13 = scmp.lt.s32.totalorder %s1750_s21, %s1750_s21 }
  0x92   :  { %p1757_p0 = por %p1756_p13, %p1755_p12 }
  0x94   :  { %p1758_p1 = pnand %p1757_p0, %p1751_p11 }
  0x96   :  { %1761 = shalt.err (!%p1758_p1)
}
  0x97   :  { %98 = dma.hbm_to_vmem [thread:$0]  %s2093_s6, 32, %s96_s18, [#allocation12]  }
  0x98   :  { %s1855_s27 = smov [#allocation16]   ;;  %s1856_s28 = smov [#allocation19]  }
  0x99   :  { %s117_s0 = sshll.u32 %s1855_s27, 4  ;;  %s139_s20 = sshll.u32 %s1856_s28, 4  ;;  %s118_s0 = int_to_ptr.vmem [resolvable:$true] %s117_s0  ;;  %s140_s20 = int_to_ptr.vmem [resolvable:$true] %s139_s20 }
  0x9a   :  { %s1762_s25 = scalar_lea.hbm %s2095_s8, 32 }
  0x9b   :  { %p1763_p2 = scmp.ne.s32.totalorder %s2095_s8, %s1762_s25  ;;  %p1766_p3 = scmp.lt.u32.totalorder %s1762_s25, %s2095_s8 }
  0x9d   :  { %p1768_p4 = pnand %p1766_p3, %p1763_p2 }
  0x9f   :  { %1771 = shalt.err (!%p1768_p4)
}
  0xa0   :  { %s1772_s6 = scalar_lea.vmem %s118_s0, 32  ;;  %p1777_p6 = scmp.lt.s32.totalorder %s118_s0, %s118_s0 }
  0xa1   :  { %p1773_p5 = scmp.ne.s32.totalorder %s118_s0, %s1772_s6  ;;  %p1778_p7 = scmp.lt.s32.totalorder %s1772_s6, %s1772_s6 }
  0xa3   :  { %p1779_p8 = por %p1778_p7, %p1777_p6 }
  0xa5   :  { %p1780_p9 = pnand %p1779_p8, %p1773_p5 }
  0xa7   :  { %1783 = shalt.err (!%p1780_p9)
}
  0xa8   :  { %120 = dma.hbm_to_vmem [thread:$0]  %s2095_s8, 32, %s118_s0, [#allocation15]  }
  0xa9   :  { %s1784_s24 = scalar_lea.hbm %s2097_s10, 16 }
  0xaa   :  { %p1785_p10 = scmp.ne.s32.totalorder %s2097_s10, %s1784_s24  ;;  %p1788_p11 = scmp.lt.u32.totalorder %s1784_s24, %s2097_s10 }
  0xac   :  { %p1790_p12 = pnand %p1788_p11, %p1785_p10 }
  0xae   :  { %1793 = shalt.err (!%p1790_p12)
}
  0xaf   :  { %s1794_s17 = scalar_lea.vmem %s140_s20, 16  ;;  %s1798_s3 = scalar_lea.vmem %s140_s20, 32 }
  0xb0   :  { %p1795_p13 = scmp.ne.s32.totalorder %s140_s20, %s1794_s17  ;;  %p1799_p0 = scmp.lt.s32.totalorder %s140_s20, %s140_s20 }
  0xb1   :  { %p1800_p1 = scmp.lt.s32.totalorder %s1798_s3, %s1794_s17 }
  0xb3   :  { %p1801_p2 = por %p1800_p1, %p1799_p0 }
  0xb5   :  { %p1802_p3 = pnand %p1801_p2, %p1795_p13 }
  0xb7   :  { %1805 = shalt.err (!%p1802_p3)
}
  0xb8   :  { %142 = dma.hbm_to_vmem [thread:$0]  %s2097_s10, 16, %s140_s20, [#allocation18]  }
  0xb9   :  { %1828 = dma.done.wait [#allocation3], 128  }
  0xba   :  { %1829 = vsyncadd [#allocation3], 4294967168 }
  0xbb   :  { %1830 = dma.done.wait [#allocation6], 1056  }
  0xbc   :  { %1831 = vsyncadd [#allocation6], 4294966240 }
  0xbd   :  { %1832 = dma.done.wait [#allocation9], 4128  }
  0xbe   :  { %1833 = vsyncadd [#allocation9], 4294963168 }
  0xbf   :  { %1834 = dma.done.wait [#allocation12], 4128  }
  0xc0   :  { %1835 = vsyncadd [#allocation12], 4294963168 }
  0xc1   :  { %1836 = dma.done.wait [#allocation15], 4128  }
  0xc2   :  { %1837 = vsyncadd [#allocation15], 4294963168 }
  0xc3   :  { %1838 = dma.done.wait [#allocation18], 2064  }
  0xc4   :  { %1839 = vsyncadd [#allocation18], 4294965232  ;;  %v1857_v0 = vmov 0   ;;  %v1392_v1 = vld [vmem:[#allocation5 + $0x4] ss:$8 sps:$4 sm:$0xff]   ;;  %v177_v14 = vld [vmem:[#allocation2] sm:$0xff] }
  0xc5   :  { %275 = vmatprep.mubr.bf16.mxu0 %v1857_v0  ;;  %v1394_v2 = vld [vmem:[#allocation5] ss:$8 sps:$4 sm:$0xff]   ;;  %243 = vmatprep.subr.bf16.mxu0 %v1392_v1  ;;  %v1395_v3 = vld [vmem:[#allocation5 + $0x14] ss:$8 sps:$4 sm:$0xff]   ;;  %v1397_v4 = vld [vmem:[#allocation5 + $0x10] ss:$8 sps:$4 sm:$0xff]   ;;  %v178_v16 = vpack.c.bf16 %v177_v14, %v177_v14 }
  0xc6   :  { %244 = vmatpush1.bf16.msra.mxu0 %v1394_v2  ;;  %v1398_v5 = vld [vmem:[#allocation5 + $0x24] ss:$8 sps:$4 sm:$0xff]   ;;  %v1400_v6 = vld [vmem:[#allocation5 + $0x20] ss:$8 sps:$4 sm:$0xff]   ;;  %v1401_v10 = vld [vmem:[#allocation5 + $0x34] ss:$8 sps:$4 sm:$0xff]  }
  0xc7   :  { %245 = vmatprep.subr.bf16.mxu0 %v1395_v3  ;;  %v1404_v7 = vld [vmem:[#allocation8 + $0x4] ss:$8 sps:$4 sm:$0xff]   ;;  %v1406_v8 = vld [vmem:[#allocation8] ss:$8 sps:$4 sm:$0xff]   ;;  %v1407_v9 = vld [vmem:[#allocation8 + $0x14] ss:$8 sps:$4 sm:$0xff]  }
  0xc8   :  { %492 = vmatprep.subr.bf16.mxu1 %v1404_v7  ;;  %v1409_v11 = vld [vmem:[#allocation8 + $0x10] ss:$8 sps:$4 sm:$0xff]   ;;  %v1410_v13 = vld [vmem:[#allocation8 + $0x24] ss:$8 sps:$4 sm:$0xff]   ;;  %v1412_v15 = vld [vmem:[#allocation8 + $0x20] ss:$8 sps:$4 sm:$0xff]   ;;  %v189_v7 = vlaneseq }
  0xc9   :  { %493 = vmatpush1.bf16.msra.mxu1 %v1406_v8  ;;  %v1403_v12 = vld [vmem:[#allocation5 + $0x30] ss:$8 sps:$4 sm:$0xff]   ;;  %vm239_vm0 = vcmask 523264   ;;  %v1418_v20 = vld [vmem:[#allocation8 + $0x40] ss:$8 sps:$4 sm:$0xff]   ;;  %s1858_s10 = smov [#allocation20]  }
  0xca   :  { %246 = vmatpush1.bf16.msra.mxu0 %v1397_v4  ;;  %494 = vmatprep.subr.bf16.mxu1 %v1407_v9  ;;  %v1413_v17 = vld [vmem:[#allocation8 + $0x34] ss:$8 sps:$4 sm:$0xff]   ;;  %v1415_v18 = vld [vmem:[#allocation8 + $0x30] ss:$8 sps:$4 sm:$0xff]   ;;  %v1416_v19 = vld [vmem:[#allocation8 + $0x44] ss:$8 sps:$4 sm:$0xff]  }
  0xcb   :  { %247 = vmatprep.subr.bf16.mxu0 %v1398_v5  ;;  %v1419_v21 = vld [vmem:[#allocation8 + $0x54] ss:$8 sps:$4 sm:$0xff]   ;;  %v1421_v22 = vld [vmem:[#allocation8 + $0x50] ss:$8 sps:$4 sm:$0xff]   ;;  %v1422_v23 = vld [vmem:[#allocation8 + $0x64] ss:$8 sps:$4 sm:$0xff]  }
  0xcc   :  { %v1424_v24 = vld [vmem:[#allocation8 + $0x60] ss:$8 sps:$4 sm:$0xff]   ;;  %v1425_v25 = vld [vmem:[#allocation8 + $0x74] ss:$8 sps:$4 sm:$0xff]   ;;  %v1427_v26 = vld [vmem:[#allocation8 + $0x70] ss:$8 sps:$4 sm:$0xff]  }
  0xcd   :  { %495 = vmatpush1.bf16.msra.mxu1 %v1409_v11  ;;  %v1428_v27 = vld [vmem:[#allocation8 + $0x84] ss:$8 sps:$4 sm:$0xff]   ;;  %v1430_v28 = vld [vmem:[#allocation8 + $0x80] ss:$8 sps:$4 sm:$0xff]   ;;  %v1431_v29 = vld [vmem:[#allocation8 + $0x94] ss:$8 sps:$4 sm:$0xff]  }
  0xce   :  { %248 = vmatpush1.bf16.msra.mxu0 %v1400_v6  ;;  %496 = vmatprep.subr.bf16.mxu1 %v1410_v13  ;;  %v1433_v30 = vld [vmem:[#allocation8 + $0x90] ss:$8 sps:$4 sm:$0xff]   ;;  %v1434_v31 = vld [vmem:[#allocation8 + $0xa4] ss:$8 sps:$4 sm:$0xff]   ;;  %v1436_v32 = vld [vmem:[#allocation8 + $0xa0] ss:$8 sps:$4 sm:$0xff]  }
  0xcf   :  { %249 = vmatprep.subr.bf16.mxu0 %v1401_v10  ;;  %v1437_v33 = vld [vmem:[#allocation8 + $0xb4] ss:$8 sps:$4 sm:$0xff]   ;;  %v1439_v34 = vld [vmem:[#allocation8 + $0xb0] ss:$8 sps:$4 sm:$0xff]   ;;  %v1440_v35 = vld [vmem:[#allocation8 + $0xc4] ss:$8 sps:$4 sm:$0xff]  }
  0xd0   :  { %v1442_v36 = vld [vmem:[#allocation8 + $0xc0] ss:$8 sps:$4 sm:$0xff]   ;;  %v1443_v37 = vld [vmem:[#allocation8 + $0xd4] ss:$8 sps:$4 sm:$0xff]   ;;  %v1445_v38 = vld [vmem:[#allocation8 + $0xd0] ss:$8 sps:$4 sm:$0xff]  }
  0xd1   :  { %497 = vmatpush1.bf16.msra.mxu1 %v1412_v15  ;;  %v1446_v39 = vld [vmem:[#allocation8 + $0xe4] ss:$8 sps:$4 sm:$0xff]   ;;  %v1448_v40 = vld [vmem:[#allocation8 + $0xe0] ss:$8 sps:$4 sm:$0xff]   ;;  %v1449_v41 = vld [vmem:[#allocation8 + $0xf4] ss:$8 sps:$4 sm:$0xff]  }
  0xd2   :  { %250 = vmatpush1.bf16.msra.mxu0 %v1403_v12  ;;  %498 = vmatprep.subr.bf16.mxu1 %v1413_v17  ;;  %v1451_v42 = vld [vmem:[#allocation8 + $0xf0] ss:$8 sps:$4 sm:$0xff]   ;;  %v1452_v43 = vld [vmem:[#allocation11] ss:$8 sps:$4 sm:$0xff]   ;;  %v190_v8 = vshrl.u32 %v189_v7, 7  ;;  %s1217_s19 = sshll.u32 %s1858_s10, 4  ;;  %s1218_s19 = int_to_ptr.vmem [resolvable:$true] %s1217_s19 }
  0xd3   :  { %v1454_v44 = vld [vmem:[#allocation11 + $0x4] ss:$8 sps:$4 sm:$0xff]   ;;  %v1457_v45 = vld [vmem:[#allocation11 + $0x14] ss:$8 sps:$4 sm:$0xff]   ;;  %v1455_v46 = vld [vmem:[#allocation11 + $0x10] ss:$8 sps:$4 sm:$0xff]   ;;  %p1811_p5 = scmp.lt.s32.totalorder %s1218_s19, %s1218_s19 }
  0xd4   :  { %741 = vmatprep.subr.bf16.mxu0 %v1454_v44  ;;  %v1460_v47 = vld [vmem:[#allocation11 + $0x24] ss:$8 sps:$4 sm:$0xff]   ;;  %v1458_v48 = vld [vmem:[#allocation11 + $0x20] ss:$8 sps:$4 sm:$0xff]   ;;  %v1463_v49 = vld [vmem:[#allocation11 + $0x34] ss:$8 sps:$4 sm:$0xff]  }
  0xd5   :  { %1239 = vmatmul.mubr.msk.bf16.vlgmr.msra.gmra.mrb[0].mxu0 %vm239_vm0, %v178_v16  ;;  %499 = vmatpush1.bf16.msra.mxu1 %v1415_v18  ;;  %v1461_v50 = vld [vmem:[#allocation11 + $0x30] ss:$8 sps:$4 sm:$0xff]   ;;  %v1466_v51 = vld [vmem:[#allocation11 + $0x44] ss:$8 sps:$4 sm:$0xff]   ;;  %v1464_v52 = vld [vmem:[#allocation11 + $0x40] ss:$8 sps:$4 sm:$0xff]  }
  0xd6   :  { %500 = vmatprep.subr.bf16.mxu1 %v1416_v19  ;;  %742 = vmatpush1.bf16.msra.mxu0 %v1452_v43  ;;  %v1469_v53 = vld [vmem:[#allocation11 + $0x54] ss:$8 sps:$4 sm:$0xff]   ;;  %v1467_v54 = vld [vmem:[#allocation11 + $0x50] ss:$8 sps:$4 sm:$0xff]   ;;  %v1472_v55 = vld [vmem:[#allocation11 + $0x64] ss:$8 sps:$4 sm:$0xff]  }
  0xd7   :  { %743 = vmatprep.subr.bf16.mxu0 %v1457_v45  ;;  %v1470_v56 = vld [vmem:[#allocation11 + $0x60] ss:$8 sps:$4 sm:$0xff]   ;;  %v1475_v57 = vld [vmem:[#allocation11 + $0x74] ss:$8 sps:$4 sm:$0xff]   ;;  %v1473_v58 = vld [vmem:[#allocation11 + $0x70] ss:$8 sps:$4 sm:$0xff]  }
  0xd8   :  { %v1478_v59 = vld [vmem:[#allocation11 + $0x84] ss:$8 sps:$4 sm:$0xff]   ;;  %v1476_v60 = vld [vmem:[#allocation11 + $0x80] ss:$8 sps:$4 sm:$0xff]   ;;  %v1481_v61 = vld [vmem:[#allocation11 + $0x94] ss:$8 sps:$4 sm:$0xff]  }
  0xd9   :  { %501 = vmatpush1.bf16.msra.mxu1 %v1418_v20  ;;  %v1479_v62 = vld [vmem:[#allocation11 + $0x90] ss:$8 sps:$4 sm:$0xff]   ;;  %v1484_v63 = vld [vmem:[#allocation11 + $0xa4] ss:$8 sps:$4 sm:$0xff]   ;;  %v1482_v0 = vld [vmem:[#allocation11 + $0xa0] ss:$8 sps:$4 sm:$0xff]  }
  0xda   :  { %502 = vmatprep.subr.bf16.mxu1 %v1419_v21  ;;  %744 = vmatpush1.bf16.msra.mxu0 %v1455_v46  ;;  %v1487_v1 = vld [vmem:[#allocation11 + $0xb4] ss:$8 sps:$4 sm:$0xff]   ;;  %v1485_v2 = vld [vmem:[#allocation11 + $0xb0] ss:$8 sps:$4 sm:$0xff]   ;;  %v1490_v3 = vld [vmem:[#allocation11 + $0xc4] ss:$8 sps:$4 sm:$0xff]  }
  0xdb   :  { %745 = vmatprep.subr.bf16.mxu0 %v1460_v47  ;;  %v1488_v4 = vld [vmem:[#allocation11 + $0xc0] ss:$8 sps:$4 sm:$0xff]   ;;  %v1493_v5 = vld [vmem:[#allocation11 + $0xd4] ss:$8 sps:$4 sm:$0xff]   ;;  %v1491_v6 = vld [vmem:[#allocation11 + $0xd0] ss:$8 sps:$4 sm:$0xff]  }
  0xdc   :  { %v2063_v9 = vsub.s32 0, %v190_v8  ;;  %v187_v10 = vld [vmem:[#allocation7] sm:$0x3]  ;;  %v2065_v11 = vsub.s32 1, %v190_v8  ;;  %v1526_v44 = vld [vmem:[#allocation14 + $0x84] ss:$8 sps:$4 sm:$0xff]  }
  0xdd   :  { %503 = vmatpush1.bf16.msra.mxu1 %v1421_v22  ;;  %v1521_v43 = vld [vmem:[#allocation14 + $0x70] ss:$8 sps:$4 sm:$0xff]   ;;  %v1524_v45 = vld [vmem:[#allocation14 + $0x80] ss:$8 sps:$4 sm:$0xff]   ;;  %v1529_v46 = vld [vmem:[#allocation14 + $0x94] ss:$8 sps:$4 sm:$0xff]  }
  0xde   :  { %504 = vmatprep.subr.bf16.mxu1 %v1422_v23  ;;  %746 = vmatpush1.bf16.msra.mxu0 %v1458_v48  ;;  %v192_v12 = vrot.slane %v187_v10, %v2063_v9  ;;  %v196_v13 = vrot.slane %v187_v10, %v2065_v11  ;;  %v1527_v47 = vld [vmem:[#allocation14 + $0x90] ss:$8 sps:$4 sm:$0xff]   ;;  %v1532_v48 = vld [vmem:[#allocation14 + $0xa4] ss:$8 sps:$4 sm:$0xff]   ;;  %v1547_v7 = vld [vmem:[#allocation14 + $0xf4] ss:$8 sps:$4 sm:$0xff]  }
  0xdf   :  { %747 = vmatprep.subr.bf16.mxu0 %v1463_v49  ;;  %v1530_v49 = vld [vmem:[#allocation14 + $0xa0] ss:$8 sps:$4 sm:$0xff]   ;;  %v1545_v8 = vld [vmem:[#allocation14 + $0xf0] ss:$8 sps:$4 sm:$0xff]   ;;  %s1806_s21 = scalar_lea.vmem %s1218_s19, 128 }
  0xe0   :  { %v1548_v10 = vld [vmem:[#allocation17 + $0x40] sm:$0xff]   ;;  %p1807_p4 = scmp.ne.s32.totalorder %s1218_s19, %s1806_s21  ;;  %p1812_p6 = scmp.lt.s32.totalorder %s1806_s21, %s1806_s21 }
  0xe1   :  { %505 = vmatpush1.bf16.msra.mxu1 %v1424_v24  ;;  %v1496_v24 = vld [vmem:[#allocation11 + $0xe4] ss:$8 sps:$4 sm:$0xff]  }
  0xe2   :  { %506 = vmatprep.subr.bf16.mxu1 %v1425_v25  ;;  %748 = vmatpush1.bf16.msra.mxu0 %v1461_v50  ;;  %v1494_v25 = vld [vmem:[#allocation11 + $0xe0] ss:$8 sps:$4 sm:$0xff]   ;;  %p1813_p7 = por %p1812_p6, %p1811_p5 }
  0xe3   :  { %749 = vmatprep.subr.bf16.mxu0 %v1466_v51  ;;  %v1535_v50 = vld [vmem:[#allocation14 + $0xb4] ss:$8 sps:$4 sm:$0xff]   ;;  %v1533_v51 = vld [vmem:[#allocation14 + $0xb0] ss:$8 sps:$4 sm:$0xff]  }
  0xe4   :  { %p1814_p8 = pnand %p1813_p7, %p1807_p4 }
  0xe5   :  { %507 = vmatpush1.bf16.msra.mxu1 %v1427_v26  ;;  %v1499_v26 = vld [vmem:[#allocation11 + $0xf4] ss:$8 sps:$4 sm:$0xff]  }
  0xe6   :  { %508 = vmatprep.subr.bf16.mxu1 %v1428_v27  ;;  %750 = vmatpush1.bf16.msra.mxu0 %v1464_v52  ;;  %v1497_v27 = vld [vmem:[#allocation11 + $0xf0] ss:$8 sps:$4 sm:$0xff]  }
  0xe7   :  { %751 = vmatprep.subr.bf16.mxu0 %v1469_v53  ;;  %v1538_v52 = vld [vmem:[#allocation14 + $0xc4] ss:$8 sps:$4 sm:$0xff]   ;;  %v1536_v53 = vld [vmem:[#allocation14 + $0xc0] ss:$8 sps:$4 sm:$0xff]  }
  0xe9   :  { %509 = vmatpush1.bf16.msra.mxu1 %v1430_v28  ;;  %v1500_v28 = vld [vmem:[#allocation14] ss:$8 sps:$4 sm:$0xff]  }
  0xea   :  { %510 = vmatprep.subr.bf16.mxu1 %v1431_v29  ;;  %752 = vmatpush1.bf16.msra.mxu0 %v1467_v54  ;;  %v1502_v29 = vld [vmem:[#allocation14 + $0x4] ss:$8 sps:$4 sm:$0xff]   ;;  %v1541_v54 = vld [vmem:[#allocation14 + $0xd4] ss:$8 sps:$4 sm:$0xff]  }
  0xeb   :  { %753 = vmatprep.subr.bf16.mxu0 %v1472_v55  ;;  %v1539_v55 = vld [vmem:[#allocation14 + $0xd0] ss:$8 sps:$4 sm:$0xff]  }
  0xed   :  { %511 = vmatpush1.bf16.msra.mxu1 %v1433_v30  ;;  %v1505_v30 = vld [vmem:[#allocation14 + $0x14] ss:$8 sps:$4 sm:$0xff]  }
  0xee   :  { %512 = vmatprep.subr.bf16.mxu1 %v1434_v31  ;;  %754 = vmatpush1.bf16.msra.mxu0 %v1470_v56  ;;  %v1503_v31 = vld [vmem:[#allocation14 + $0x10] ss:$8 sps:$4 sm:$0xff]   ;;  %v320_v56 = vld [vmem:[#allocation10] sm:$0x3] }
  0xef   :  { %755 = vmatprep.subr.bf16.mxu0 %v1475_v57  ;;  %v325_v57 = vrot.slane %v320_v56, %v2063_v9 }
  0xf1   :  { %513 = vmatpush1.bf16.msra.mxu1 %v1436_v32  ;;  %v1508_v32 = vld [vmem:[#allocation14 + $0x24] ss:$8 sps:$4 sm:$0xff]  }
  0xf2   :  { %514 = vmatprep.subr.bf16.mxu1 %v1437_v33  ;;  %756 = vmatpush1.bf16.msra.mxu0 %v1473_v58  ;;  %v1506_v33 = vld [vmem:[#allocation14 + $0x20] ss:$8 sps:$4 sm:$0xff]   ;;  %v329_v58 = vrot.slane %v320_v56, %v2065_v11 }
  0xf3   :  { %757 = vmatprep.subr.bf16.mxu0 %v1478_v59 }
  0xf5   :  { %515 = vmatpush1.bf16.msra.mxu1 %v1439_v34  ;;  %v1511_v34 = vld [vmem:[#allocation14 + $0x34] ss:$8 sps:$4 sm:$0xff]  }
  0xf6   :  { %516 = vmatprep.subr.bf16.mxu1 %v1440_v35  ;;  %758 = vmatpush1.bf16.msra.mxu0 %v1476_v60  ;;  %v1509_v35 = vld [vmem:[#allocation14 + $0x30] ss:$8 sps:$4 sm:$0xff]  }
  0xf7   :  { %759 = vmatprep.subr.bf16.mxu0 %v1481_v61 }
  0xf9   :  { %517 = vmatpush1.bf16.msra.mxu1 %v1442_v36  ;;  %v1514_v36 = vld [vmem:[#allocation14 + $0x44] ss:$8 sps:$4 sm:$0xff]  }
  0xfa   :  { %518 = vmatprep.subr.bf16.mxu1 %v1443_v37  ;;  %760 = vmatpush1.bf16.msra.mxu0 %v1479_v62  ;;  %v1512_v37 = vld [vmem:[#allocation14 + $0x40] ss:$8 sps:$4 sm:$0xff]  }
  0xfb   :  { %761 = vmatprep.subr.bf16.mxu0 %v1484_v63 }
  0xfd   :  { %519 = vmatpush1.bf16.msra.mxu1 %v1445_v38  ;;  %v1517_v38 = vld [vmem:[#allocation14 + $0x54] ss:$8 sps:$4 sm:$0xff]  }
  0xfe   :  { %520 = vmatprep.subr.bf16.mxu1 %v1446_v39  ;;  %762 = vmatpush1.bf16.msra.mxu0 %v1482_v0  ;;  %v1515_v39 = vld [vmem:[#allocation14 + $0x50] ss:$8 sps:$4 sm:$0xff]  }
  0xff   :  { %763 = vmatprep.subr.bf16.mxu0 %v1487_v1 }
 0x101   :  { %521 = vmatpush1.bf16.msra.mxu1 %v1448_v40  ;;  %v1520_v40 = vld [vmem:[#allocation14 + $0x64] ss:$8 sps:$4 sm:$0xff]  }
 0x102   :  { %522 = vmatprep.subr.bf16.mxu1 %v1449_v41  ;;  %764 = vmatpush1.bf16.msra.mxu0 %v1485_v2  ;;  %v1518_v41 = vld [vmem:[#allocation14 + $0x60] ss:$8 sps:$4 sm:$0xff]  }
 0x103   :  { %765 = vmatprep.subr.bf16.mxu0 %v1490_v3 }
 0x105   :  { %523 = vmatpush1.bf16.msra.mxu1 %v1451_v42  ;;  %v1523_v42 = vld [vmem:[#allocation14 + $0x74] ss:$8 sps:$4 sm:$0xff]  }
 0x106   :  { %766 = vmatpush1.bf16.msra.mxu0 %v1488_v4  ;;  %990 = vmatprep.subr.bf16.mxu1 %v1502_v29 }
 0x107   :  { %767 = vmatprep.subr.bf16.mxu0 %v1493_v5  ;;  %v1544_v5 = vld [vmem:[#allocation14 + $0xe4] ss:$8 sps:$4 sm:$0xff]  }
 0x10a   :  { %768 = vmatpush1.bf16.msra.mxu0 %v1491_v6  ;;  %v1542_v6 = vld [vmem:[#allocation14 + $0xe0] ss:$8 sps:$4 sm:$0xff]  }
 0x10b   :  { %769 = vmatprep.subr.bf16.mxu0 %v1496_v24 }
 0x10e   :  { %770 = vmatpush1.bf16.msra.mxu0 %v1494_v25 }
 0x10f   :  { %771 = vmatprep.subr.bf16.mxu0 %v1499_v26 }
 0x112   :  { %772 = vmatpush1.bf16.msra.mxu0 %v1497_v27 }
 0x113   :  { %1353 = vmatprep.subr.bf16.mxu0 %v1548_v10 }
 0x1a8   :  { %v277_v14 = vpop.f32.mrb[0].mxu0 }
 0x1a9   :  { %v278_v15 = vadd.f32 %v277_v14, %v192_v12  ;;  %v279_v16 = vpop.f32.mrb[1].mxu0  ;;  %v1549_v12 = vld [vmem:[#allocation17] sm:$0xff]   ;;  %v1551_v14 = vld [vmem:[#allocation17 + $0x8] sm:$0xff]  }
 0x1aa   :  { %v280_v17 = vadd.f32 %v279_v16, %v196_v13  ;;  %v281_v18 = vpop.f32.mrb[2].mxu0  ;;  %v1550_v13 = vld [vmem:[#allocation17 + $0x48] sm:$0xff]   ;;  %v1553_v16 = vld [vmem:[#allocation17 + $0x10] sm:$0xff]  }
 0x1ab   :  { %v284_v19 = vmax.f32 %v278_v15, 0.0  ;;  %v282_v20 = vpop.f32.mrb[3].mxu0  ;;  %v1552_v15 = vld [vmem:[#allocation17 + $0x50] sm:$0xff]   ;;  %v1555_v18 = vld [vmem:[#allocation17 + $0x18] sm:$0xff]  }
 0x1ac   :  { %v285_v21 = vmax.f32 %v280_v17, 0.0  ;;  %v1554_v17 = vld [vmem:[#allocation17 + $0x58] sm:$0xff]   ;;  %v1557_v20 = vld [vmem:[#allocation17 + $0x20] sm:$0xff]  }
 0x1ad   :  { %v286_v23 = vpack.c.bf16 %v284_v19, %v284_v19  ;;  %v1556_v19 = vld [vmem:[#allocation17 + $0x60] sm:$0xff]  }
 0x1ae   :  { %v287_v22 = vpack.c.bf16 %v285_v21, %v285_v21  ;;  %v1558_v21 = vld [vmem:[#allocation17 + $0x68] sm:$0xff]  }
 0x1b0   :  { %524 = vmatprep.mubr.bf16.mxu1 %v287_v22  ;;  %v1559_v22 = vld [vmem:[#allocation17 + $0x28] sm:$0xff]  }
 0x1b1   :  { %525 = vmatmul.mubr.bf16.vlgmr.msra.gmra.mrb[0].mxu1 %v286_v23  ;;  %v569_v23 = vld [vmem:[#allocation13] sm:$0x3] }
 0x1b2   :  { %991 = vmatpush1.bf16.msra.mxu1 %v1500_v28  ;;  %v574_v24 = vrot.slane %v569_v23, %v2063_v9  ;;  %v578_v25 = vrot.slane %v569_v23, %v2065_v11 }
 0x1b3   :  { %992 = vmatprep.subr.bf16.mxu1 %v1505_v30 }
 0x1b6   :  { %993 = vmatpush1.bf16.msra.mxu1 %v1503_v31 }
 0x1b7   :  { %994 = vmatprep.subr.bf16.mxu1 %v1508_v32 }
 0x1ba   :  { %995 = vmatpush1.bf16.msra.mxu1 %v1506_v33 }
 0x1bb   :  { %996 = vmatprep.subr.bf16.mxu1 %v1511_v34 }
 0x1be   :  { %997 = vmatpush1.bf16.msra.mxu1 %v1509_v35 }
 0x1bf   :  { %998 = vmatprep.subr.bf16.mxu1 %v1514_v36  ;;  %v1560_v36 = vld [vmem:[#allocation17 + $0x70] sm:$0xff]  }
 0x1c2   :  { %999 = vmatpush1.bf16.msra.mxu1 %v1512_v37  ;;  %v1561_v37 = vld [vmem:[#allocation17 + $0x30] sm:$0xff]  }
 0x1c3   :  { %1000 = vmatprep.subr.bf16.mxu1 %v1517_v38  ;;  %v1562_v38 = vld [vmem:[#allocation17 + $0x78] sm:$0xff]  }
 0x1c6   :  { %1001 = vmatpush1.bf16.msra.mxu1 %v1515_v39  ;;  %v1563_v39 = vld [vmem:[#allocation17 + $0x38] sm:$0xff]  }
 0x1c7   :  { %1002 = vmatprep.subr.bf16.mxu1 %v1520_v40  ;;  %v818_v40 = vld [vmem:[#allocation16] sm:$0x3] }
 0x1ca   :  { %1003 = vmatpush1.bf16.msra.mxu1 %v1518_v41  ;;  %v823_v41 = vrot.slane %v818_v40, %v2063_v9 }
 0x1cb   :  { %1004 = vmatprep.subr.bf16.mxu1 %v1523_v42  ;;  %v827_v42 = vrot.slane %v818_v40, %v2065_v11 }
 0x1ce   :  { %1005 = vmatpush1.bf16.msra.mxu1 %v1521_v43 }
 0x1cf   :  { %1006 = vmatprep.subr.bf16.mxu1 %v1526_v44 }
 0x1d2   :  { %1007 = vmatpush1.bf16.msra.mxu1 %v1524_v45 }
 0x1d3   :  { %1008 = vmatprep.subr.bf16.mxu1 %v1529_v46 }
 0x1d6   :  { %1009 = vmatpush1.bf16.msra.mxu1 %v1527_v47 }
 0x1d7   :  { %1010 = vmatprep.subr.bf16.mxu1 %v1532_v48 }
 0x1da   :  { %1011 = vmatpush1.bf16.msra.mxu1 %v1530_v49 }
 0x1db   :  { %1012 = vmatprep.subr.bf16.mxu1 %v1535_v50 }
 0x1de   :  { %1013 = vmatpush1.bf16.msra.mxu1 %v1533_v51 }
 0x1df   :  { %1014 = vmatprep.subr.bf16.mxu1 %v1538_v52 }
 0x1e2   :  { %1015 = vmatpush1.bf16.msra.mxu1 %v1536_v53 }
 0x1e3   :  { %1016 = vmatprep.subr.bf16.mxu1 %v1541_v54  ;;  %v1336_v54 = vld [vmem:[#allocation19] ss:$0 sm:$0xff] }
 0x1e6   :  { %1017 = vmatpush1.bf16.msra.mxu1 %v1539_v55 }
 0x1e7   :  { %1018 = vmatprep.subr.bf16.mxu1 %v1544_v5 }
 0x1ea   :  { %1019 = vmatpush1.bf16.msra.mxu1 %v1542_v6 }
 0x1eb   :  { %1020 = vmatprep.subr.bf16.mxu1 %v1547_v7 }
 0x1ee   :  { %1021 = vmatpush1.bf16.msra.mxu1 %v1545_v8 }
 0x284   :  { %v526_v59 = vpop.f32.mrb[0].mxu1 }
 0x285   :  { %v527_v60 = vadd.f32 %v526_v59, %v325_v57  ;;  %v528_v61 = vpop.f32.mrb[1].mxu1 }
 0x286   :  { %v529_v62 = vadd.f32 %v528_v61, %v329_v58  ;;  %v530_v63 = vpop.f32.mrb[2].mxu1 }
 0x287   :  { %v533_v0 = vmax.f32 %v527_v60, 0.0  ;;  %v531_v1 = vpop.f32.mrb[3].mxu1 }
 0x288   :  { %v534_v2 = vmax.f32 %v529_v62, 0.0 }
 0x289   :  { %v535_v4 = vpack.c.bf16 %v533_v0, %v533_v0 }
 0x28a   :  { %v536_v3 = vpack.c.bf16 %v534_v2, %v534_v2 }
 0x28c   :  { %773 = vmatprep.mubr.bf16.mxu0 %v536_v3 }
 0x28d   :  { %774 = vmatmul.mubr.bf16.vlgmr.msra.gmra.mrb[4].mxu0 %v535_v4 }
 0x28e   :  { %1354 = vmatpush3.bf16.msra.mxu0 %v1549_v12 }
 0x28f   :  { %1355 = vmatprep.subr.bf16.mxu0 %v1550_v13 }
 0x292   :  { %1356 = vmatpush3.bf16.msra.mxu0 %v1551_v14 }
 0x293   :  { %1357 = vmatprep.subr.bf16.mxu0 %v1552_v15 }
 0x296   :  { %1358 = vmatpush3.bf16.msra.mxu0 %v1553_v16 }
 0x297   :  { %1359 = vmatprep.subr.bf16.mxu0 %v1554_v17 }
 0x29a   :  { %1360 = vmatpush3.bf16.msra.mxu0 %v1555_v18 }
 0x29b   :  { %1361 = vmatprep.subr.bf16.mxu0 %v1556_v19 }
 0x29e   :  { %1362 = vmatpush3.bf16.msra.mxu0 %v1557_v20 }
 0x29f   :  { %1363 = vmatprep.subr.bf16.mxu0 %v1558_v21 }
 0x2a2   :  { %1364 = vmatpush3.bf16.msra.mxu0 %v1559_v22 }
 0x2a3   :  { %1365 = vmatprep.subr.bf16.mxu0 %v1560_v36 }
 0x2a6   :  { %1366 = vmatpush3.bf16.msra.mxu0 %v1561_v37 }
 0x2a7   :  { %1367 = vmatprep.subr.bf16.mxu0 %v1562_v38 }
 0x2aa   :  { %1368 = vmatpush3.bf16.msra.mxu0 %v1563_v39 }
 0x360   :  { %v775_v26 = vpop.f32.mrb[4].mxu0 }
 0x361   :  { %v776_v27 = vadd.f32 %v775_v26, %v574_v24  ;;  %v777_v28 = vpop.f32.mrb[5].mxu0 }
 0x362   :  { %v778_v29 = vadd.f32 %v777_v28, %v578_v25  ;;  %v779_v30 = vpop.f32.mrb[6].mxu0 }
 0x363   :  { %v782_v31 = vmax.f32 %v776_v27, 0.0  ;;  %v780_v32 = vpop.f32.mrb[7].mxu0 }
 0x364   :  { %v783_v33 = vmax.f32 %v778_v29, 0.0 }
 0x365   :  { %v784_v35 = vpack.c.bf16 %v782_v31, %v782_v31 }
 0x366   :  { %v785_v34 = vpack.c.bf16 %v783_v33, %v783_v33 }
 0x368   :  { %1022 = vmatprep.mubr.bf16.mxu1 %v785_v34 }
 0x369   :  { %1023 = vmatmul.mubr.bf16.vlgmr.msra.gmra.mrb[4].mxu1 %v784_v35 }
 0x43c   :  { %v1024_v43 = vpop.f32.mrb[4].mxu1 }
 0x43d   :  { %v1025_v44 = vadd.f32 %v1024_v43, %v823_v41  ;;  %v1026_v45 = vpop.f32.mrb[5].mxu1 }
 0x43e   :  { %v1027_v46 = vadd.f32 %v1026_v45, %v827_v42  ;;  %v1028_v47 = vpop.f32.mrb[6].mxu1 }
 0x43f   :  { %v1031_v48 = vmax.f32 %v1025_v44, 0.0  ;;  %v1029_v49 = vpop.f32.mrb[7].mxu1 }
 0x440   :  { %v1032_v50 = vmax.f32 %v1027_v46, 0.0 }
 0x441   :  { %v1033_v52 = vpack.c.bf16 %v1031_v48, %v1031_v48 }
 0x442   :  { %v1034_v51 = vpack.c.bf16 %v1032_v50, %v1032_v50 }
 0x444   :  { %1202 = vmatprep.mubr.bf16.mxu0 %v1034_v51 }
 0x445   :  { %1203 = vmatmul.mubr.bf16.vlgmr.msra.gmra.mrb[8].mxu0 %v1033_v52 }
 0x518   :  { %v1369_v53 = vpop.f32.mrb[8].mxu0 }
 0x519   :  { %v1370_v55 = vpop.f32.mrb[9].mxu0 }
 0x51a   :  { %v1371_v9 = vadd.f32 %v1370_v55, %v1369_v53  ;;  %v1372_v56 = vpop.f32.mrb[10].mxu0 }
 0x51b   :  { %v1373_v11 = vpop.f32.mrb[11].mxu0 }
 0x51c   :  { %v1205_v57 = vadd.f32 %v1371_v9, %v1336_v54 }
 0x51e   :  { %1210 = vst [vmem:[#allocation20] sm:$0xff] %v1205_v57 }
 0x51f   :  { %1817 = shalt.err (!%p1814_p8)
}
 0x520   :  { %s1818_s27 = scalar_lea.hbm %s2098_s11, 128 }
 0x521   :  { %p1819_p9 = scmp.ne.s32.totalorder %s2098_s11, %s1818_s27  ;;  %p1822_p10 = scmp.lt.u32.totalorder %s1818_s27, %s2098_s11 }
 0x523   :  { %p1824_p11 = pnand %p1822_p10, %p1819_p9 }
 0x525   :  { %1827 = shalt.err (!%p1824_p11)
}
 0x526   :  { %1220 = dma.vmem_to_hbm [thread:$0]  %s1218_s19, 128, %s2098_s11, [#allocation4]  }
 0x527   :  { %1840 = dma.done.wait [#allocation4], 128  }
 0x528   :  { %1841 = vsyncadd [#allocation4], 4294967168 }
 0x529   :  { %1224 = vsyncpa [#allocation3], 1 }
 0x52a   :  { %1225 = vsyncpa [#allocation6], 1 }
 0x52b   :  { %1226 = vsyncpa [#allocation9], 1 }
 0x52c   :  { %1227 = vsyncpa [#allocation12], 1 }
 0x52d   :  { %1228 = vsyncpa [#allocation15], 1 }
 0x52e   :  { %1229 = vsyncpa [#allocation18], 1 }
 0x52f   :  { %1230 = vsyncpa [#allocation4], 1 }

</bundles_post_ra>
